<compile_context>
chip_gen: v7x
topology: tpu7x:2x2x1
jax: 0.10.0
libtpu: 0.0.40
codegen_flags: <defaults>
</compile_context>

<pallas_src>
import jax
import jax.numpy as jnp
from jax.experimental import pallas as pl
from jax.experimental.pallas import tpu as pltpu


def _round_up(x, m):
    return ((x + m - 1) // m) * m


def _vmem_limit_bytes():
    # ~3/4 of physical VMEM, capped at 100 MiB:
    #   v7x (64 MiB)  -> 48 MiB,   v5e/v6e (128 MiB) -> 96 MiB.
    try:
        cap = pltpu.get_tpu_info().vmem_capacity_bytes
    except Exception:
        cap = 64 * 1024 * 1024  # safe fallback on every generation
    return int(min(cap * 3 // 4, 100 * 1024 * 1024))


# --------------------------------- kernel ---------------------------------

def vnlinear_kernel(x_ref, w_ref, b_ref, o_ref):
    # x_ref: [tm, K]   w_ref: [K, Nout]   b_ref: [1, Nout]   o_ref: [tm, Nout]
    acc = jnp.dot(x_ref[...], w_ref[...], preferred_element_type=jnp.float32)
    o_ref[...] = (acc + b_ref[...]).astype(o_ref.dtype)


# ------------------------------- JAX wrapper -------------------------------

def vn_linear_pallas(x, weight, bias=None, *, tile_m=1024):
    """VNLinear forward.

    x:      [B, N, C_in, 3]   (PyTorch layout)
    weight: [C_out, C_in]     (PyTorch nn.Linear weight)
    bias:   [C_out] or None
    returns [B, N, C_out, 3]
    """
    B, N, C_in, D = x.shape
    assert D == 3, "VNLinear expects trailing vector dimension of size 3"
    C_out = weight.shape[0]

    M = B * N
    K = C_in * 3          # fused contraction dim (c, d) -> c*3 + d
    Nout = C_out * 3      # fused output dim     (o, d) -> o*3 + d

    # Free (contiguous) view -- no transpose, no padding, no extra HBM pass.
    x_flat = x.reshape(M, K)

    # Block-diagonal weight: W_big[c*3+d', o*3+d] = W[o, c] * (d' == d).
    # Tiny (built from the [C_out, C_in] weight), computed once.
    w_big = jnp.kron(weight.T, jnp.eye(3, dtype=weight.dtype)).astype(x.dtype)
    if bias is not None:
        b_big = jnp.repeat(bias.astype(jnp.float32), 3).reshape(1, Nout)
    else:
        b_big = jnp.zeros((1, Nout), jnp.float32)

    # ---- row-tile sizing --------------------------------------------------
    itemsize = jnp.dtype(x.dtype).itemsize
    vmem_limit = _vmem_limit_bytes()
    if M <= 8:
        tm = M                                   # full-extent block
    else:
        # big tiles for fewer grid steps, but keep >= 2 programs so both
        # v7x TensorCores get work; tm must be a multiple of 8.
        tm = min(tile_m, _round_up(pl.cdiv(M, 2), 8))
        tm = max(tm, 8)
        # keep double-buffered x/out tiles + resident weights well under VMEM
        def _bytes(t):
            return 2 * t * (K * itemsize + Nout * itemsize) + 2 * K * Nout * itemsize
        while tm > 8 and _bytes(tm) > (vmem_limit * 6) // 10:
            tm = max(8, _round_up(tm // 2, 8))
    grid_m = pl.cdiv(M, tm)

    out_flat = pl.pallas_call(
        vnlinear_kernel,
        out_shape=jax.ShapeDtypeStruct((M, Nout), x.dtype),
        grid_spec=pltpu.PrefetchScalarGridSpec(
            num_scalar_prefetch=0,
            grid=(grid_m,),
            in_specs=[
                pl.BlockSpec((tm, K), lambda i: (i, 0)),      # x rows, streamed
                pl.BlockSpec((K, Nout), lambda i: (0, 0)),    # weights, resident
                pl.BlockSpec((1, Nout), lambda i: (0, 0)),    # bias, resident
            ],
            out_specs=pl.BlockSpec((tm, Nout), lambda i: (i, 0)),
        ),
        compiler_params=pltpu.CompilerParams(
            dimension_semantics=("parallel",),  # shard row tiles across TCs (v7x)
            vmem_limit_bytes=vmem_limit,
        ),
    )(x_flat, w_big, b_big)

    # Free view back to the PyTorch layout [B, N, C_out, 3].
    return out_flat.reshape(B, N, C_out, 3)


# ---------------------------------- main ----------------------------------

if __name__ == "__main__":
    key = jax.random.PRNGKey(0)
    kx, kw, kb = jax.random.split(key, 3)

    B, Ns, C_in, C_out = 2, 16, 8, 16
    x = jax.random.normal(kx, (B, Ns, C_in, 3), jnp.float32)
    weight = jax.random.normal(kw, (C_out, C_in), jnp.float32) * 0.3
    bias = jax.random.normal(kb, (C_out,), jnp.float32) * 0.3

    out = vn_linear_pallas(x, weight, bias)
    jax.block_until_ready(out)

    # pure-JAX reference of the PyTorch forward
    ref = jnp.einsum("bncd,oc->bnod", x, weight) + bias[None, None, :, None]

    assert out.shape == (B, Ns, C_out, 3), "bad output shape"
    assert jnp.allclose(out, ref, atol=1e-4, rtol=1e-4), "VNLinear output mismatch"
    print("KERNEL_OK")
</pallas_src>

<mosaic_0001>
module attributes {stable_mosaic.version = 11 : i64} {
  func.func @vnlinear_kernel(%arg0: i32, %arg1: memref<16x24xf32, #tpu.memory_space<vmem>>, %arg2: memref<24x48xf32, #tpu.memory_space<vmem>>, %arg3: memref<1x48xf32, #tpu.memory_space<vmem>>, %arg4: memref<16x48xf32, #tpu.memory_space<vmem>>) attributes {dimension_semantics = [#tpu.dimension_semantics<parallel>], iteration_bounds = array<i64: 2>, scalar_prefetch = 0 : i64, scratch_operands = 0 : i64, tpu.core_type = #tpu.core_type<tc>, window_params = [{transform_indices = @transform_0, window_bounds = array<i64: 16, 24>}, {pipeline_mode = #tpu.pipeline_mode<synchronous>, transform_indices = @transform_1, window_bounds = array<i64: 24, 48>}, {pipeline_mode = #tpu.pipeline_mode<synchronous>, transform_indices = @transform_2, window_bounds = array<i64: 1, 48>}, {transform_indices = @transform_3, window_bounds = array<i64: 16, 48>}]} {
    %c0 = arith.constant 0 : index
    %c0_0 = arith.constant 0 : index
    %0 = vector.load %arg1[%c0, %c0_0] : memref<16x24xf32, #tpu.memory_space<vmem>>, vector<16x24xf32>
    %c0_1 = arith.constant 0 : index
    %c0_2 = arith.constant 0 : index
    %1 = vector.load %arg2[%c0_1, %c0_2] : memref<24x48xf32, #tpu.memory_space<vmem>>, vector<24x48xf32>
    %cst = arith.constant dense<0.000000e+00> : vector<16x48xf32>
    %2 = tpu.matmul %0, %1, %cst {dimension_numbers = #tpu.dot_dimension_numbers<[1], [0], [0], [1], [0, 0, 1, 1], [], []>} : vector<16x24xf32>, vector<24x48xf32>, vector<16x48xf32> -> vector<16x48xf32>
    %c0_3 = arith.constant 0 : index
    %c0_4 = arith.constant 0 : index
    %3 = vector.load %arg3[%c0_3, %c0_4] : memref<1x48xf32, #tpu.memory_space<vmem>>, vector<1x48xf32>
    %4 = vector.broadcast %3 : vector<1x48xf32> to vector<16x48xf32>
    %5 = arith.addf %2, %4 : vector<16x48xf32>
    %c0_5 = arith.constant 0 : index
    %c0_6 = arith.constant 0 : index
    %6 = vector.load %arg4[%c0_5, %c0_6] : memref<16x48xf32, #tpu.memory_space<vmem>>, vector<16x48xf32>
    tpu.vector_store %arg4[%c0_5, %c0_6], %5 {strides = array<i32>} : memref<16x48xf32, #tpu.memory_space<vmem>>, vector<16x48xf32>,
    return
  }
  func.func @transform_0(%arg0: i32) -> (i32, i32) {
    %c0_i32 = arith.constant 0 : i32
    %c0_i32_0 = arith.constant 0 : i32
    return %arg0, %c0_i32 : i32, i32
  }
  func.func @transform_1(%arg0: i32) -> (i32, i32) {
    %c0_i32 = arith.constant 0 : i32
    %c0_i32_0 = arith.constant 0 : i32
    %c0_i32_1 = arith.constant 0 : i32
    return %c0_i32, %c0_i32_0 : i32, i32
  }
  func.func @transform_2(%arg0: i32) -> (i32, i32) {
    %c0_i32 = arith.constant 0 : i32
    %c0_i32_0 = arith.constant 0 : i32
    %c0_i32_1 = arith.constant 0 : i32
    return %c0_i32, %c0_i32_0 : i32, i32
  }
  func.func @transform_3(%arg0: i32) -> (i32, i32) {
    %c0_i32 = arith.constant 0 : i32
    %c0_i32_0 = arith.constant 0 : i32
    return %arg0, %c0_i32 : i32, i32
  }
}

</mosaic_0001>

<bundles_post_ra>
// kernel: tpu_custom_call.1
= control target key start
LH: loop header
LB: loop body
LE: loop exit
PB: predicated region body
PF: predicated region fallthrough
CT: control target
= control target key end

     0   :  { %8 = vsyncpa [#allocation3], 0  ;;  %s621_s0 = inlined_call_operand.vmem [shape: f32[32,24], index: 0, kind: input, shape index: {}]   ;;  %s622_s1 = inlined_call_operand.vmem [shape: f32[24,48], index: 1, kind: input, shape index: {}]   ;;  %s623_s2 = inlined_call_operand.vmem [shape: f32[1,48], index: 2, kind: input, shape index: {}]   ;;  %s624_s3 = inlined_call_operand.hbm [shape: f32[32,48], index: 3, kind: output, shape index: {}]  }
   0x1   :  { %10 = vsyncpa [#allocation3 + $0x1], 0  ;;  %s507_s12 = smov 0   ;;  %s509_s13 = smov 0  }
   0x2   :  { %s511_s14 = smov 0   ;;  %s513_s15 = smov 0  }
   0x3 LB: > { %s528_s16 = sadd.s32 4294967295, %s482_s15   ;;  %s345_s17 = sadd.s32 4294967294, %s482_s15   ;;  %s482_s15 = sphi %s513_s15, %s630_s15   ;;  %s478_s14 = sphi %s511_s14, %s629_s14   ;;  %s474_s13 = sphi %s509_s13, %s628_s13   ;;  %s470_s12 = sphi %s507_s12, %s627_s12  }
   0x4   : > { %s532_s18 = sadd.s32 1, %s482_s15   ;;  %s91_s19 = sadd.s32 1, %s478_s14 }
   0x5   : > { %s88_s20 = ssub.s32 %s482_s15, %s532_s18  ;;  %p101_p0 = scmp.ne.s32.totalorder %s478_s14, %s474_s13 }
   0x6   : > { %p89_p1 = scmp.eq.s32.totalorder %s88_s20, 0  ;;  %p102_p2 = scmp.eq.s32.totalorder %s528_s16, 1 }
   0x7   : > { %p107_p3 = scmp.ne.s32.totalorder %s474_s13, %s470_s12  ;;  %p108_p4 = scmp.eq.s32.totalorder %s345_s17, 1 }
   0x8   : > { %s543_s21 = scalar_select %p89_p1, %s478_s14, %s91_s19  }
   0x9   : > { %p545_p5 = por %p102_p2, %p101_p0  ;;  %p549_p6 = por %p108_p4, %p107_p3 }
   0xa   : > { %p348_p7 = scmp.ge.s32.totalorder %s482_s15, 1  ;;  %p141_p8 = scmp.lt.s32.totalorder %s482_s15, 3 }
   0xc   : > { %p142_p9 = pnand %p348_p7, %p141_p8 }
   0xd   : > { %v174_v0 = vld [vmem:[%s622_s1] sm:$0xff] (!%p142_p9)  ;;  %v175_v1 = vld [vmem:[%s622_s1 + $0x8] sm:$0xff] (!%p142_p9)  ;;  %s350_s28 = sshll.u32 (!%p142_p9), %s528_s16, 1  ;;  %v176_v3 = vld [vmem:[%s622_s1 + $0x10] sm:$0xff] (!%p142_p9)  ;;  %vm184_vm0 = vcmask (!%p142_p9), 195584   ;;  %s162_s8 = sand.u32 (!%p142_p9), 1, %s474_s13  }
   0xe   : > { %145 = sbr.rel (%p142_p9) target bundleno = 256 (0x100), region = 32  ;;  %v375_v2 = vpack.c.bf16 (!%p142_p9), %v175_v1, %v174_v0  ;;  %p166_p10 = scmp.lt.s32.totalorder (!%p142_p9), %s350_s28, 3  ;;  %v352_v6 = vld [vmem:[%s623_s2] ss:$0 sm:$0xff] (!%p142_p9)  ;;  %vm266_vm1 = vcmask (!%p142_p9), 392192  }
   0xf   : > { %s349_s9 = sshll.u32 (!%p142_p9), %s162_s8, 4  ;;  %s360_s20 = sshll.u32 (!%p142_p9), %s528_s16, 8 }
  0x10   : > { %376 = vmatprep.subr.bf16.mxu0 (!%p142_p9), %v375_v2  ;;  %s164_s17 = scalar_lea.vmem (!%p142_p9), [#allocation2], %s349_s9  ;;  %s578_s26 = scalar_lea.hbm (!%p142_p9), %s624_s3, %s360_s20 }
  0x11   : > { %378 = vmatpush3.bf16.msra.mxu0 (!%p142_p9), %v375_v2  ;;  %s283_s19 = sshll.u32 (!%p142_p9), %s164_s17, 4  ;;  %s580_s27 = scalar_lea.sflag (!%p142_p9), [#allocation3], %s162_s8  ;;  %s573_s19 = int_to_ptr.vmem [resolvable:$true] %s283_s19 }
  0x12   : > { %370 = vmatprep.subr.mxu0 (!%p142_p9), %v176_v3  ;;  %s420_s16 = scalar_lea.vmem (!%p142_p9), %s573_s19, 256 }
  0x13   : > { %p421_p11 = scmp.ne.s32.totalorder (!%p142_p9), %s573_s19, %s420_s16 }
  0x15   : > { %s632_s28 = smov (!%p166_p10, %s350_s28), 3  ;;  %371 = vmatpush3.msra.mxu0 %v176_v3  ;;  %p422_p12 = pnand %p421_p11, %p545_p5 }
  0x16   : > { %s351_s4 = sshll.u32 %s632_s28, 3  ;;  %s484_s28 = smov [#allocation2]  }
  0x17   : > { %s169_s7 = scalar_lea.vmem %s621_s0, %s351_s4  ;;  %p423_p13 = pneg %p422_p12 }
  0x18   : > { %v172_v4 = vld [vmem:[%s169_s7] sm:$0xff]  ;;  %v173_v5 = vld [vmem:[%s169_s7 + $0x8] sm:$0xff]  ;;  %s424_s29 = sshll.u32 %s484_s28, 4  ;;  %s425_s29 = int_to_ptr.vmem [resolvable:$false] %s424_s29 }
  0x19   : > { %372 = vmatprep.mubr.msk.f32.mxu0 %vm184_vm0, %v172_v4  ;;  %s426_s30 = scalar_lea.vmem %s425_s29, 512  ;;  %p427_p0 = scmp.lt.s32.totalorder %s573_s19, %s425_s29 }
  0x1a   : > { %373 = vmatmul.mubr.msk.f32.vlgmr.msra.gmra.mrb[0].mxu0 %vm184_vm0, %v173_v5  ;;  %p428_p1 = scmp.lt.s32.totalorder %s426_s30, %s420_s16 }
  0x1c   : > { %p429_p2 = por %p428_p1, %p427_p0 }
  0x1e   : > { %p430_p3 = pnand %p429_p2, %p423_p13 }
  0xed   : > { %v374_v7 = vpop.f32.mrb[0].mxu0 }
  0xee   : > { %v263_v8 = vadd.f32 %v374_v7, %v352_v6  ;;  %v257_v9 = vpop.f32.mrb[1].mxu0 }
  0xef   : > { %v258_v10 = vadd.f32 %v352_v6, %v257_v9 }
  0xf0   : > { %268 = vst.msk [vmem:[%s164_s17 + $0x8] sm:$0xff] %vm266_vm1, %v263_v8 }
  0xf1   : > { %267 = vst.msk [vmem:[%s164_s17] sm:$0xff] %vm266_vm1, %v258_v10 }
  0xf2   : > { %433 = shalt.err (!%p430_p3)
}
  0xf3   : > { %s434_s4 = scalar_lea.hbm %s578_s26, 256  ;;  %s438_s7 = scalar_lea.hbm %s624_s3, 512 }
  0xf4   : > { %p435_p4 = scmp.ne.s32.totalorder %s578_s26, %s434_s4  ;;  %p439_p9 = scmp.lt.u32.totalorder %s578_s26, %s624_s3 }
  0xf5   : > { %p440_p10 = scmp.lt.u32.totalorder %s438_s7, %s434_s4  ;;  %p442_p12 = scmp.lt.u32.totalorder %s434_s4, %s578_s26 }
  0xf6   : > { %p436_p7 = pnand %p435_p4, %p545_p5 }
  0xf7   : > { %p441_p11 = por %p440_p10, %p439_p9 }
  0xf8   : > { %p437_p8 = pneg %p436_p7 }
  0xf9   : > { %p443_p13 = por %p442_p12, %p441_p11 }
  0xfb   : > { %p444_p0 = pnand %p443_p13, %p437_p8 }
  0xfd   : > { %447 = shalt.err (!%p444_p0)
}
  0xfe   : > { %s485_s10 = smov 128   ;;  %s486_s11 = smov 8  }
  0xff   : > { %379 = dma.vmem_to_hbm [thread:$0]  (%p545_p5), %s573_s19, 256, %s578_s26, %s580_s27, %s485_s10, %s485_s10, %s486_s11  }
 0x100 PF: > { %p385_p1 = scmp.ge.s32.totalorder %s482_s15, 2  ;;  %s298_s17 = sand.u32 1, %s470_s12  }
 0x101   : > { %s299_s20 = scalar_lea.sflag [#allocation3], %s298_s17 }
 0x102   : > { %p382_p2 = pnand %p385_p1, %p549_p6 }
 0x104   : > { %465 = dma.done.wait (!%p382_p2), %s299_s20, 256  }
 0x105   : > { %467 = vsyncadd (!%p382_p2), %s299_s20, 4294967040  ;;  %p13_p3 = scmp.ge.s32.totalorder %s532_s18, 4   ;;  %s627_s12 = smov %s474_s13 }
 0x106   : > { %s628_s13 = smov %s478_s14  ;;  %s629_s14 = smov %s543_s21 }
 0x107   : > { %s630_s15 = smov %s532_s18  ;;  %15 = sbr.rel (!%p13_p3) target bundleno = 3 (0x3), region = 67 }
 0x10e   :  { %304 = vsyncpa [#allocation3], 1 }
 0x10f   :  { %306 = vsyncpa [#allocation3 + $0x1], 1 }

</bundles_post_ra>
